<compile_context>
chip_gen: v7x
topology: tpu7x:2x2x1
jax: 0.10.0
libtpu: 0.0.40
codegen_flags: <defaults>
</compile_context>

<pallas_src>
import functools

import jax
import jax.numpy as jnp
from jax.experimental import pallas as pl
from jax.experimental.pallas import tpu as pltpu

INPUT_DIM = 486
HIDDEN_DIM = 256
OUTPUT_DIM = 3
OUT_PAD = 8          # 3 -> 8 output columns (f32); sliced back to 3 in the wrapper.


def _round_up(n, m):
    return ((n + m - 1) // m) * m


def bc_policy_kernel(x_ref, w1_ref, b1_ref, w2_ref, b2_ref, w3_ref, b3_ref, o_ref):
    # x tile is bf16 (cast in wrapper); MXU bf16 x bf16 -> f32 accumulate; bias/ReLU in f32.
    h1 = jnp.dot(x_ref[...], w1_ref[...], preferred_element_type=jnp.float32) + b1_ref[...]
    h1 = jnp.maximum(h1, 0.0)

    h2 = jnp.dot(h1.astype(jnp.bfloat16), w2_ref[...],
                 preferred_element_type=jnp.float32) + b2_ref[...]
    h2 = jnp.maximum(h2, 0.0)

    o_ref[...] = jnp.dot(h2.astype(jnp.bfloat16), w3_ref[...],
                         preferred_element_type=jnp.float32) + b3_ref[...]


def prepare_params(raw):
    """Cast / pad raw f32 params once (amortized across calls).

    raw weights are pre-transposed to (in, out); biases are (1, out) f32.
    Only the tiny output layer gets padded (3 -> OUT_PAD columns, zeros => neutral).
    """
    w3 = jnp.zeros((HIDDEN_DIM, OUT_PAD), jnp.float32).at[:, :OUTPUT_DIM].set(raw["w3"])
    b3 = jnp.zeros((1, OUT_PAD), jnp.float32).at[:, :OUTPUT_DIM].set(raw["b3"])
    return {
        "w1": raw["w1"].astype(jnp.bfloat16),   # (486, 256) unpadded
        "b1": raw["b1"].astype(jnp.float32),
        "w2": raw["w2"].astype(jnp.bfloat16),
        "b2": raw["b2"].astype(jnp.float32),
        "w3": w3.astype(jnp.bfloat16),
        "b3": b3,
    }


@functools.partial(jax.jit, static_argnames=("block_b",))
def bc_policy_forward(x, params, *, block_b=512):
    """x: (B, 486) float32; params from prepare_params(). Returns (B, 3) float32."""
    B = x.shape[0]
    # bf16 sublane packing likes multiples of 16; tm shrinks for small batches.
    tm = min(block_b, _round_up(max(B, 1), 16))
    bp = _round_up(B, tm)
    n_tiles = bp // tm

    # Cast to bf16 (required producer op) and pad batch rows only if needed; the pad
    # fuses with the cast so there is no extra full-HBM round trip of x.
    xb = x.astype(jnp.bfloat16)
    if bp != B:
        xb = jnp.pad(xb, ((0, bp - B), (0, 0)))

    w1, b1 = params["w1"], params["b1"]
    w2, b2 = params["w2"], params["b2"]
    w3, b3 = params["w3"], params["b3"]

    flops = 2 * bp * (INPUT_DIM * HIDDEN_DIM
                      + HIDDEN_DIM * HIDDEN_DIM
                      + HIDDEN_DIM * OUT_PAD)
    bytes_accessed = (
        bp * INPUT_DIM * 2                            # bf16 activations in
        + (w1.size + w2.size + w3.size) * 2           # bf16 weights
        + (b1.size + b2.size + b3.size) * 4           # f32 biases
        + bp * OUT_PAD * 4                            # f32 output
    )

    out = pl.pallas_call(
        bc_policy_kernel,
        out_shape=jax.ShapeDtypeStruct((bp, OUT_PAD), jnp.float32),
        grid=(n_tiles,),
        in_specs=[
            pl.BlockSpec((tm, INPUT_DIM), lambda i: (i, 0)),
            # Weights / biases: constant block index -> stay VMEM-resident across steps.
            pl.BlockSpec((INPUT_DIM, HIDDEN_DIM), lambda i: (0, 0)),
            pl.BlockSpec((1, HIDDEN_DIM), lambda i: (0, 0)),
            pl.BlockSpec((HIDDEN_DIM, HIDDEN_DIM), lambda i: (0, 0)),
            pl.BlockSpec((1, HIDDEN_DIM), lambda i: (0, 0)),
            pl.BlockSpec((HIDDEN_DIM, OUT_PAD), lambda i: (0, 0)),
            pl.BlockSpec((1, OUT_PAD), lambda i: (0, 0)),
        ],
        out_specs=pl.BlockSpec((tm, OUT_PAD), lambda i: (i, 0)),
        compiler_params=pltpu.CompilerParams(
            dimension_semantics=(pltpu.PARALLEL,),
        ),
        cost_estimate=pl.CostEstimate(
            flops=flops, transcendentals=0, bytes_accessed=bytes_accessed),
    )(xb, w1, b1, w2, b2, w3, b3)

    return out[:B, :OUTPUT_DIM]


def init_params(key, input_dim=INPUT_DIM, hidden_dim=HIDDEN_DIM, output_dim=OUTPUT_DIM):
    """PyTorch-style uniform(-1/sqrt(fan_in), 1/sqrt(fan_in)); weights pre-transposed to (in, out)."""
    ks = jax.random.split(key, 6)

    def linear(kw, kb, fan_in, fan_out):
        bound = 1.0 / jnp.sqrt(fan_in)
        w = jax.random.uniform(kw, (fan_in, fan_out), jnp.float32, -bound, bound)
        b = jax.random.uniform(kb, (1, fan_out), jnp.float32, -bound, bound)
        return w, b

    w1, b1 = linear(ks[0], ks[1], input_dim, hidden_dim)
    w2, b2 = linear(ks[2], ks[3], hidden_dim, hidden_dim)
    w3, b3 = linear(ks[4], ks[5], hidden_dim, output_dim)
    return {"w1": w1, "b1": b1, "w2": w2, "b2": b2, "w3": w3, "b3": b3}


def reference_forward_f32(x, raw):
    h1 = jnp.maximum(x @ raw["w1"] + raw["b1"], 0.0)
    h2 = jnp.maximum(h1 @ raw["w2"] + raw["b2"], 0.0)
    return h2 @ raw["w3"] + raw["b3"]


def reference_forward_bf16(x, raw):
    """Emulates the kernel's numeric path: bf16 operands, f32 accumulate, f32 bias/ReLU."""
    bf = jnp.bfloat16
    h1 = jnp.maximum(
        jnp.dot(x.astype(bf), raw["w1"].astype(bf),
                preferred_element_type=jnp.float32) + raw["b1"], 0.0)
    h2 = jnp.maximum(
        jnp.dot(h1.astype(bf), raw["w2"].astype(bf),
                preferred_element_type=jnp.float32) + raw["b2"], 0.0)
    return jnp.dot(h2.astype(bf), raw["w3"].astype(bf),
                   preferred_element_type=jnp.float32) + raw["b3"]


if __name__ == "__main__":
    key = jax.random.PRNGKey(0)
    k_param, k_x1, k_x2 = jax.random.split(key, 3)

    raw = init_params(k_param)
    params = prepare_params(raw)

    # Case 1: small deployment-style batch, single tile.
    batch = 8
    x = jax.random.normal(k_x1, (batch, INPUT_DIM), dtype=jnp.float32)
    out = jax.block_until_ready(bc_policy_forward(x, params))
    assert out.shape == (batch, OUTPUT_DIM)
    assert jnp.allclose(out, reference_forward_bf16(x, raw), atol=1e-2, rtol=1e-2), \
        "mismatch vs bf16 reference (case 1)"
    assert jnp.allclose(out, reference_forward_f32(x, raw), atol=5e-2, rtol=5e-2), \
        "mismatch vs f32 reference (case 1)"

    # Case 2: batch not divisible by the tile -> exercises multi-tile grid + row padding.
    batch2 = 40
    x2 = jax.random.normal(k_x2, (batch2, INPUT_DIM), dtype=jnp.float32)
    out2 = jax.block_until_ready(bc_policy_forward(x2, params, block_b=16))
    assert out2.shape == (batch2, OUTPUT_DIM)
    assert jnp.allclose(out2, reference_forward_bf16(x2, raw), atol=1e-2, rtol=1e-2), \
        "mismatch vs bf16 reference (case 2)"
    assert jnp.allclose(out2, reference_forward_f32(x2, raw), atol=5e-2, rtol=5e-2), \
        "mismatch vs f32 reference (case 2)"

    print("KERNEL_OK")
</pallas_src>

<mosaic_0001>
module attributes {stable_mosaic.version = 11 : i64} {
  func.func @bc_policy_kernel(%arg0: i32, %arg1: memref<16x486xbf16, #tpu.memory_space<vmem>>, %arg2: memref<486x256xbf16, #tpu.memory_space<vmem>>, %arg3: memref<1x256xf32, #tpu.memory_space<vmem>>, %arg4: memref<256x256xbf16, #tpu.memory_space<vmem>>, %arg5: memref<1x256xf32, #tpu.memory_space<vmem>>, %arg6: memref<256x8xbf16, #tpu.memory_space<vmem>>, %arg7: memref<1x8xf32, #tpu.memory_space<vmem>>, %arg8: memref<16x8xf32, #tpu.memory_space<vmem>>) attributes {dimension_semantics = [#tpu.dimension_semantics<parallel>], iteration_bounds = array<i64: 1>, scalar_prefetch = 0 : i64, scratch_operands = 0 : i64, tpu.core_type = #tpu.core_type<tc>, window_params = [{transform_indices = @transform_0, window_bounds = array<i64: 16, 486>}, {pipeline_mode = #tpu.pipeline_mode<synchronous>, transform_indices = @transform_1, window_bounds = array<i64: 486, 256>}, {pipeline_mode = #tpu.pipeline_mode<synchronous>, transform_indices = @transform_2, window_bounds = array<i64: 1, 256>}, {pipeline_mode = #tpu.pipeline_mode<synchronous>, transform_indices = @transform_3, window_bounds = array<i64: 256, 256>}, {pipeline_mode = #tpu.pipeline_mode<synchronous>, transform_indices = @transform_4, window_bounds = array<i64: 1, 256>}, {pipeline_mode = #tpu.pipeline_mode<synchronous>, transform_indices = @transform_5, window_bounds = array<i64: 256, 8>}, {pipeline_mode = #tpu.pipeline_mode<synchronous>, transform_indices = @transform_6, window_bounds = array<i64: 1, 8>}, {transform_indices = @transform_7, window_bounds = array<i64: 16, 8>}]} {
    %c0 = arith.constant 0 : index
    %c0_0 = arith.constant 0 : index
    %0 = vector.load %arg1[%c0, %c0_0] : memref<16x486xbf16, #tpu.memory_space<vmem>>, vector<16x486xbf16>
    %c0_1 = arith.constant 0 : index
    %c0_2 = arith.constant 0 : index
    %1 = vector.load %arg2[%c0_1, %c0_2] : memref<486x256xbf16, #tpu.memory_space<vmem>>, vector<486x256xbf16>
    %cst = arith.constant dense<0.000000e+00> : vector<16x256xf32>
    %2 = tpu.matmul %0, %1, %cst {dimension_numbers = #tpu.dot_dimension_numbers<[1], [0], [0], [1], [0, 0, 1, 1], [], []>} : vector<16x486xbf16>, vector<486x256xbf16>, vector<16x256xf32> -> vector<16x256xf32>
    %c0_3 = arith.constant 0 : index
    %c0_4 = arith.constant 0 : index
    %3 = vector.load %arg3[%c0_3, %c0_4] : memref<1x256xf32, #tpu.memory_space<vmem>>, vector<1x256xf32>
    %4 = vector.broadcast %3 : vector<1x256xf32> to vector<16x256xf32>
    %5 = arith.addf %2, %4 : vector<16x256xf32>
    %cst_5 = arith.constant 0.000000e+00 : f32
    %6 = vector.broadcast %cst_5 : f32 to vector<16x256xf32>
    %7 = arith.maximumf %5, %6 : vector<16x256xf32>
    %8 = arith.truncf %7 : vector<16x256xf32> to vector<16x256xbf16>
    %c0_6 = arith.constant 0 : index
    %c0_7 = arith.constant 0 : index
    %9 = vector.load %arg4[%c0_6, %c0_7] : memref<256x256xbf16, #tpu.memory_space<vmem>>, vector<256x256xbf16>
    %cst_8 = arith.constant dense<0.000000e+00> : vector<16x256xf32>
    %10 = tpu.matmul %8, %9, %cst_8 {dimension_numbers = #tpu.dot_dimension_numbers<[1], [0], [0], [1], [0, 0, 1, 1], [], []>} : vector<16x256xbf16>, vector<256x256xbf16>, vector<16x256xf32> -> vector<16x256xf32>
    %c0_9 = arith.constant 0 : index
    %c0_10 = arith.constant 0 : index
    %11 = vector.load %arg5[%c0_9, %c0_10] : memref<1x256xf32, #tpu.memory_space<vmem>>, vector<1x256xf32>
    %12 = vector.broadcast %11 : vector<1x256xf32> to vector<16x256xf32>
    %13 = arith.addf %10, %12 : vector<16x256xf32>
    %cst_11 = arith.constant 0.000000e+00 : f32
    %14 = vector.broadcast %cst_11 : f32 to vector<16x256xf32>
    %15 = arith.maximumf %13, %14 : vector<16x256xf32>
    %16 = arith.truncf %15 : vector<16x256xf32> to vector<16x256xbf16>
    %c0_12 = arith.constant 0 : index
    %c0_13 = arith.constant 0 : index
    %17 = vector.load %arg6[%c0_12, %c0_13] : memref<256x8xbf16, #tpu.memory_space<vmem>>, vector<256x8xbf16>
    %cst_14 = arith.constant dense<0.000000e+00> : vector<16x8xf32>
    %18 = tpu.matmul %16, %17, %cst_14 {dimension_numbers = #tpu.dot_dimension_numbers<[1], [0], [0], [1], [0, 0, 1, 1], [], []>} : vector<16x256xbf16>, vector<256x8xbf16>, vector<16x8xf32> -> vector<16x8xf32>
    %c0_15 = arith.constant 0 : index
    %c0_16 = arith.constant 0 : index
    %19 = vector.load %arg7[%c0_15, %c0_16] : memref<1x8xf32, #tpu.memory_space<vmem>>, vector<1x8xf32>
    %20 = vector.broadcast %19 : vector<1x8xf32> to vector<16x8xf32>
    %21 = arith.addf %18, %20 : vector<16x8xf32>
    %c0_17 = arith.constant 0 : index
    %c0_18 = arith.constant 0 : index
    %22 = vector.load %arg8[%c0_17, %c0_18] : memref<16x8xf32, #tpu.memory_space<vmem>>, vector<16x8xf32>
    tpu.vector_store %arg8[%c0_17, %c0_18], %21 {strides = array<i32>} : memref<16x8xf32, #tpu.memory_space<vmem>>, vector<16x8xf32>,
    return
  }
  func.func @transform_0(%arg0: i32) -> (i32, i32) {
    %c0_i32 = arith.constant 0 : i32
    %c0_i32_0 = arith.constant 0 : i32
    return %arg0, %c0_i32 : i32, i32
  }
  func.func @transform_1(%arg0: i32) -> (i32, i32) {
    %c0_i32 = arith.constant 0 : i32
    %c0_i32_0 = arith.constant 0 : i32
    %c0_i32_1 = arith.constant 0 : i32
    return %c0_i32, %c0_i32_0 : i32, i32
  }
  func.func @transform_2(%arg0: i32) -> (i32, i32) {
    %c0_i32 = arith.constant 0 : i32
    %c0_i32_0 = arith.constant 0 : i32
    %c0_i32_1 = arith.constant 0 : i32
    return %c0_i32, %c0_i32_0 : i32, i32
  }
  func.func @transform_3(%arg0: i32) -> (i32, i32) {
    %c0_i32 = arith.constant 0 : i32
    %c0_i32_0 = arith.constant 0 : i32
    %c0_i32_1 = arith.constant 0 : i32
    return %c0_i32, %c0_i32_0 : i32, i32
  }
  func.func @transform_4(%arg0: i32) -> (i32, i32) {
    %c0_i32 = arith.constant 0 : i32
    %c0_i32_0 = arith.constant 0 : i32
    %c0_i32_1 = arith.constant 0 : i32
    return %c0_i32, %c0_i32_0 : i32, i32
  }
  func.func @transform_5(%arg0: i32) -> (i32, i32) {
    %c0_i32 = arith.constant 0 : i32
    %c0_i32_0 = arith.constant 0 : i32
    %c0_i32_1 = arith.constant 0 : i32
    return %c0_i32, %c0_i32_0 : i32, i32
  }
  func.func @transform_6(%arg0: i32) -> (i32, i32) {
    %c0_i32 = arith.constant 0 : i32
    %c0_i32_0 = arith.constant 0 : i32
    %c0_i32_1 = arith.constant 0 : i32
    return %c0_i32, %c0_i32_0 : i32, i32
  }
  func.func @transform_7(%arg0: i32) -> (i32, i32) {
    %c0_i32 = arith.constant 0 : i32
    %c0_i32_0 = arith.constant 0 : i32
    return %arg0, %c0_i32 : i32, i32
  }
}

</mosaic_0001>

<bundles_post_ra>
// kernel: bc_policy_forward.1
= control target key start
LH: loop header
LB: loop body
LE: loop exit
PB: predicated region body
PF: predicated region fallthrough
CT: control target
= control target key end

     0   :  { %12 = vsyncpa [#allocation3], 0  ;;  %s1501_s0 = inlined_call_operand.vmem [shape: bf16[16,486], index: 0, kind: input, shape index: {}]   ;;  %s1502_s1 = inlined_call_operand.hbm [shape: bf16[486,256], index: 1, kind: input, shape index: {}]   ;;  %s1503_s2 = inlined_call_operand.vmem [shape: f32[1,256], index: 2, kind: input, shape index: {}]   ;;  %s1504_s3 = inlined_call_operand.hbm [shape: bf16[256,256], index: 3, kind: input, shape index: {}]   ;;  %s1505_s4 = inlined_call_operand.vmem [shape: f32[1,256], index: 4, kind: input, shape index: {}]   ;;  %s1506_s5 = inlined_call_operand.vmem [shape: bf16[256,8], index: 5, kind: input, shape index: {}]   ;;  %s1507_s6 = inlined_call_operand.vmem [shape: f32[1,8], index: 6, kind: input, shape index: {}]   ;;  %s1508_s7 = inlined_call_operand.vmem [shape: f32[16,8], index: 7, kind: output, shape index: {}]  }
   0x1   :  { %13 = vsyncpa [#allocation5], 0  ;;  %s1358_s24 = smov [#allocation2]   ;;  %s1310_s28 = scalar_lea.hbm %s1502_s1, 7808 }
   0x2   :  { %s21_s25 = sshll.u32 %s1358_s24, 4  ;;  %p1311_p0 = scmp.ne.s32.totalorder %s1502_s1, %s1310_s28  ;;  %s22_s25 = int_to_ptr.vmem [resolvable:$true] %s21_s25 }
   0x3   :  { %p1314_p1 = scmp.lt.u32.totalorder %s1310_s28, %s1502_s1 }
   0x5   :  { %p1316_p2 = pnand %p1314_p1, %p1311_p0 }
   0x7   :  { %1319 = shalt.err (!%p1316_p2)
}
   0x8   :  { %s1320_s10 = scalar_lea.vmem %s22_s25, 7808  ;;  %p1325_p4 = scmp.lt.s32.totalorder %s22_s25, %s22_s25 }
   0x9   :  { %p1321_p3 = scmp.ne.s32.totalorder %s22_s25, %s1320_s10  ;;  %p1326_p5 = scmp.lt.s32.totalorder %s1320_s10, %s1320_s10 }
   0xb   :  { %p1327_p6 = por %p1326_p5, %p1325_p4 }
   0xd   :  { %p1328_p7 = pnand %p1327_p6, %p1321_p3 }
   0xf   :  { %1331 = shalt.err (!%p1328_p7)
}
  0x10   :  { %s1359_s11 = smov 128   ;;  %s1360_s12 = smov 8  }
  0x11   :  { %27 = dma.hbm_to_vmem [thread:$0]  %s1502_s1, 7808, %s22_s25, [#allocation3], %s1359_s11, %s1359_s11, %s1360_s12  }
  0x12   :  { %s1361_s15 = smov [#allocation4]   ;;  %s1332_s19 = scalar_lea.hbm %s1504_s3, 4096 }
  0x13   :  { %s35_s16 = sshll.u32 %s1361_s15, 4  ;;  %p1333_p8 = scmp.ne.s32.totalorder %s1504_s3, %s1332_s19  ;;  %s36_s16 = int_to_ptr.vmem [resolvable:$true] %s35_s16 }
  0x14   :  { %p1336_p9 = scmp.lt.u32.totalorder %s1332_s19, %s1504_s3 }
  0x16   :  { %p1338_p10 = pnand %p1336_p9, %p1333_p8 }
  0x18   :  { %1341 = shalt.err (!%p1338_p10)
}
  0x19   :  { %s1342_s24 = scalar_lea.vmem %s36_s16, 4096  ;;  %p1347_p12 = scmp.lt.s32.totalorder %s36_s16, %s36_s16 }
  0x1a   :  { %p1343_p11 = scmp.ne.s32.totalorder %s36_s16, %s1342_s24  ;;  %p1348_p13 = scmp.lt.s32.totalorder %s1342_s24, %s1342_s24 }
  0x1c   :  { %p1349_p0 = por %p1348_p13, %p1347_p12 }
  0x1e   :  { %p1350_p1 = pnand %p1349_p0, %p1343_p11 }
  0x20   :  { %1353 = shalt.err (!%p1350_p1)
}
  0x21   :  { %41 = dma.hbm_to_vmem [thread:$0]  %s1504_s3, 4096, %s36_s16, [#allocation5], %s1359_s11, %s1359_s11, %s1360_s12  }
  0x22   :  { %1354 = dma.done.wait [#allocation3], 7808  }
  0x23   :  { %1355 = vsyncadd [#allocation3], 4294959488 }
  0x24   :  { %1356 = dma.done.wait [#allocation5], 4096  }
  0x25   :  { %1357 = vsyncadd [#allocation5], 4294963200  ;;  %v1148_v0 = vld [vmem:[#allocation2 + $0x4] ss:$8 sps:$4 sm:$0xff]   ;;  %v1150_v1 = vld [vmem:[#allocation2] ss:$8 sps:$4 sm:$0xff]  }
  0x26   :  { %467 = vmatprep.subr.bf16.mxu0 %v1148_v0  ;;  %v1151_v2 = vld [vmem:[#allocation2 + $0x14] ss:$8 sps:$4 sm:$0xff]   ;;  %v1153_v3 = vld [vmem:[#allocation2 + $0x10] ss:$8 sps:$4 sm:$0xff]   ;;  %v1154_v4 = vld [vmem:[#allocation2 + $0x24] ss:$8 sps:$4 sm:$0xff]  }
  0x27   :  { %468 = vmatpush1.bf16.msra.mxu0 %v1150_v1  ;;  %v1156_v5 = vld [vmem:[#allocation2 + $0x20] ss:$8 sps:$4 sm:$0xff]   ;;  %v1157_v6 = vld [vmem:[#allocation2 + $0x34] ss:$8 sps:$4 sm:$0xff]   ;;  %v1159_v7 = vld [vmem:[#allocation2 + $0x30] ss:$8 sps:$4 sm:$0xff]  }
  0x28   :  { %469 = vmatprep.subr.bf16.mxu0 %v1151_v2  ;;  %v1160_v8 = vld [vmem:[#allocation2 + $0x44] ss:$8 sps:$4 sm:$0xff]   ;;  %v1162_v9 = vld [vmem:[#allocation2 + $0x40] ss:$8 sps:$4 sm:$0xff]   ;;  %v1163_v10 = vld [vmem:[#allocation2 + $0x54] ss:$8 sps:$4 sm:$0xff]  }
  0x29   :  { %v1165_v11 = vld [vmem:[#allocation2 + $0x50] ss:$8 sps:$4 sm:$0xff]   ;;  %v1166_v12 = vld [vmem:[#allocation2 + $0x64] ss:$8 sps:$4 sm:$0xff]   ;;  %v1168_v14 = vld [vmem:[#allocation2 + $0x60] ss:$8 sps:$4 sm:$0xff]  }
  0x2a   :  { %v1198_v13 = vld [vmem:[%s1501_s0 + $0x4] ss:$16 sps:$4 sm:$0xff]   ;;  %v1171_v16 = vld [vmem:[#allocation2 + $0x70] ss:$8 sps:$4 sm:$0xff]   ;;  %v1174_v18 = vld [vmem:[#allocation2 + $0x80] ss:$8 sps:$4 sm:$0xff]  }
  0x2b   :  { %470 = vmatpush1.bf16.msra.mxu0 %v1153_v3  ;;  %v1169_v15 = vld [vmem:[#allocation2 + $0x74] ss:$8 sps:$4 sm:$0xff]   ;;  %499 = vmatprep.mubr.bf16.mxu0 %v1198_v13  ;;  %v1172_v17 = vld [vmem:[#allocation2 + $0x84] ss:$8 sps:$4 sm:$0xff]   ;;  %v1177_v20 = vld [vmem:[#allocation2 + $0x90] ss:$8 sps:$4 sm:$0xff]  }
  0x2c   :  { %471 = vmatprep.subr.bf16.mxu0 %v1154_v4  ;;  %v1175_v19 = vld [vmem:[#allocation2 + $0x94] ss:$8 sps:$4 sm:$0xff]   ;;  %v1178_v21 = vld [vmem:[#allocation2 + $0xa4] ss:$8 sps:$4 sm:$0xff]   ;;  %v1180_v22 = vld [vmem:[#allocation2 + $0xa0] ss:$8 sps:$4 sm:$0xff]  }
  0x2d   :  { %v1181_v23 = vld [vmem:[#allocation2 + $0xb4] ss:$8 sps:$4 sm:$0xff]   ;;  %v1183_v24 = vld [vmem:[#allocation2 + $0xb0] ss:$8 sps:$4 sm:$0xff]   ;;  %v1184_v25 = vld [vmem:[#allocation2 + $0xc4] ss:$8 sps:$4 sm:$0xff]  }
  0x2e   :  { %v1246_v26 = vld [vmem:[#allocation4 + $0x4] ss:$8 sps:$4 sm:$0xff]   ;;  %v1248_v27 = vld [vmem:[#allocation4] ss:$8 sps:$4 sm:$0xff]   ;;  %v1249_v28 = vld [vmem:[#allocation4 + $0x14] ss:$8 sps:$4 sm:$0xff]  }
  0x2f   :  { %472 = vmatpush1.bf16.msra.mxu0 %v1156_v5  ;;  %763 = vmatprep.subr.bf16.mxu1 %v1246_v26  ;;  %v1186_v29 = vld [vmem:[#allocation2 + $0xc0] ss:$8 sps:$4 sm:$0xff]   ;;  %v1252_v31 = vld [vmem:[#allocation4 + $0x24] ss:$8 sps:$4 sm:$0xff]   ;;  %v1189_v33 = vld [vmem:[#allocation2 + $0xd0] ss:$8 sps:$4 sm:$0xff]  }
  0x30   :  { %473 = vmatprep.subr.bf16.mxu0 %v1157_v6  ;;  %764 = vmatpush1.bf16.msra.mxu1 %v1248_v27  ;;  %v1251_v30 = vld [vmem:[#allocation4 + $0x10] ss:$8 sps:$4 sm:$0xff]   ;;  %v1187_v32 = vld [vmem:[#allocation2 + $0xd4] ss:$8 sps:$4 sm:$0xff]   ;;  %v1254_v34 = vld [vmem:[#allocation4 + $0x20] ss:$8 sps:$4 sm:$0xff]  }
  0x31   :  { %765 = vmatprep.subr.bf16.mxu1 %v1249_v28  ;;  %v1255_v35 = vld [vmem:[#allocation4 + $0x34] ss:$8 sps:$4 sm:$0xff]   ;;  %v1192_v37 = vld [vmem:[#allocation2 + $0xe0] ss:$8 sps:$4 sm:$0xff]   ;;  %v1258_v39 = vld [vmem:[#allocation4 + $0x44] ss:$8 sps:$4 sm:$0xff]  }
  0x32   :  { %v1190_v36 = vld [vmem:[#allocation2 + $0xe4] ss:$8 sps:$4 sm:$0xff]   ;;  %v1257_v38 = vld [vmem:[#allocation4 + $0x30] ss:$8 sps:$4 sm:$0xff]   ;;  %v1193_v40 = vld [vmem:[#allocation2 + $0xf4] ss:$8 sps:$4 sm:$0xff]  }
  0x33   :  { %474 = vmatpush1.bf16.msra.mxu0 %v1159_v7  ;;  %v1195_v41 = vld [vmem:[#allocation2 + $0xf0] ss:$8 sps:$4 sm:$0xff]   ;;  %v1261_v43 = vld [vmem:[#allocation4 + $0x54] ss:$8 sps:$4 sm:$0xff]   ;;  %v1199_v46 = vld [vmem:[#allocation2 + $0x100] ss:$8 sps:$4 sm:$0xff]  }
  0x34   :  { %475 = vmatprep.subr.bf16.mxu0 %v1160_v8  ;;  %766 = vmatpush1.bf16.msra.mxu1 %v1251_v30  ;;  %v1260_v42 = vld [vmem:[#allocation4 + $0x40] ss:$8 sps:$4 sm:$0xff]   ;;  %v1201_v45 = vld [vmem:[#allocation2 + $0x104] ss:$8 sps:$4 sm:$0xff]   ;;  %v1263_v48 = vld [vmem:[#allocation4 + $0x50] ss:$8 sps:$4 sm:$0xff]  }
  0x35   :  { %767 = vmatprep.subr.bf16.mxu1 %v1252_v31  ;;  %v1196_v44 = vld [vmem:[%s1501_s0] ss:$16 sps:$4 sm:$0xff]   ;;  %v1243_v47 = vld [vmem:[%s1501_s0 + $0xc] ss:$16 sps:$4 sm:$0xff]   ;;  %vm456_vm0 = vcmask 834560   ;;  %vm460_vm1 = vcmask 1042432  }
  0x36   :  { %v1204_v49 = vld [vmem:[#allocation2 + $0x114] ss:$8 sps:$4 sm:$0xff]   ;;  %v1266_v51 = vld [vmem:[#allocation4 + $0x60] ss:$8 sps:$4 sm:$0xff]   ;;  %v1207_v54 = vld [vmem:[#allocation2 + $0x124] ss:$8 sps:$4 sm:$0xff]  }
  0x37   :  { %476 = vmatpush1.bf16.msra.mxu0 %v1162_v9  ;;  %v1264_v50 = vld [vmem:[#allocation4 + $0x64] ss:$8 sps:$4 sm:$0xff]   ;;  %v1202_v52 = vld [vmem:[#allocation2 + $0x110] ss:$8 sps:$4 sm:$0xff]   ;;  %v1267_v53 = vld [vmem:[#allocation4 + $0x74] ss:$8 sps:$4 sm:$0xff]  }
  0x38   :  { %477 = vmatprep.subr.bf16.mxu0 %v1163_v10  ;;  %768 = vmatpush1.bf16.msra.mxu1 %v1254_v34  ;;  %v1269_v55 = vld [vmem:[#allocation4 + $0x70] ss:$8 sps:$4 sm:$0xff]   ;;  %v1270_v57 = vld [vmem:[#allocation4 + $0x84] ss:$8 sps:$4 sm:$0xff]   ;;  %v1272_v59 = vld [vmem:[#allocation4 + $0x80] ss:$8 sps:$4 sm:$0xff]  }
  0x39   :  { %769 = vmatprep.subr.bf16.mxu1 %v1255_v35  ;;  %v1205_v56 = vld [vmem:[#allocation2 + $0x120] ss:$8 sps:$4 sm:$0xff]   ;;  %v1210_v58 = vld [vmem:[#allocation2 + $0x134] ss:$8 sps:$4 sm:$0xff]   ;;  %v1208_v60 = vld [vmem:[#allocation2 + $0x130] ss:$8 sps:$4 sm:$0xff]  }
  0x3a   :  { %v1273_v61 = vld [vmem:[#allocation4 + $0x94] ss:$8 sps:$4 sm:$0xff]   ;;  %v1275_v63 = vld [vmem:[#allocation4 + $0x90] ss:$8 sps:$4 sm:$0xff]   ;;  %v1276_v1 = vld [vmem:[#allocation4 + $0xa4] ss:$8 sps:$4 sm:$0xff]  }
  0x3b   :  { %478 = vmatpush1.bf16.msra.mxu0 %v1165_v11  ;;  %v1213_v62 = vld [vmem:[#allocation2 + $0x144] ss:$8 sps:$4 sm:$0xff]   ;;  %v1211_v0 = vld [vmem:[#allocation2 + $0x140] ss:$8 sps:$4 sm:$0xff]   ;;  %v1216_v2 = vld [vmem:[#allocation2 + $0x154] ss:$8 sps:$4 sm:$0xff]  }
  0x3c   :  { %479 = vmatprep.subr.bf16.mxu0 %v1166_v12  ;;  %770 = vmatpush1.bf16.msra.mxu1 %v1257_v38  ;;  %v1278_v3 = vld [vmem:[#allocation4 + $0xa0] ss:$8 sps:$4 sm:$0xff]   ;;  %v1279_v5 = vld [vmem:[#allocation4 + $0xb4] ss:$8 sps:$4 sm:$0xff]   ;;  %v1281_v7 = vld [vmem:[#allocation4 + $0xb0] ss:$8 sps:$4 sm:$0xff]  }
  0x3d   :  { %771 = vmatprep.subr.bf16.mxu1 %v1258_v39  ;;  %v1214_v4 = vld [vmem:[#allocation2 + $0x150] ss:$8 sps:$4 sm:$0xff]   ;;  %v1219_v6 = vld [vmem:[#allocation2 + $0x164] ss:$8 sps:$4 sm:$0xff]   ;;  %v1217_v8 = vld [vmem:[#allocation2 + $0x160] ss:$8 sps:$4 sm:$0xff]  }
  0x3e   :  { %v1282_v9 = vld [vmem:[#allocation4 + $0xc4] ss:$8 sps:$4 sm:$0xff]   ;;  %v1284_v11 = vld [vmem:[#allocation4 + $0xc0] ss:$8 sps:$4 sm:$0xff]   ;;  %v1285_v13 = vld [vmem:[#allocation4 + $0xd4] ss:$8 sps:$4 sm:$0xff]  }
  0x3f   :  { %480 = vmatpush1.bf16.msra.mxu0 %v1168_v14  ;;  %v1222_v10 = vld [vmem:[#allocation2 + $0x174] ss:$8 sps:$4 sm:$0xff]   ;;  %v1220_v12 = vld [vmem:[#allocation2 + $0x170] ss:$8 sps:$4 sm:$0xff]   ;;  %v1225_v14 = vld [vmem:[#allocation2 + $0x184] ss:$8 sps:$4 sm:$0xff]  }
  0x40   :  { %481 = vmatprep.subr.bf16.mxu0 %v1169_v15  ;;  %772 = vmatpush1.bf16.msra.mxu1 %v1260_v42  ;;  %v1223_v15 = vld [vmem:[#allocation2 + $0x180] ss:$8 sps:$4 sm:$0xff]   ;;  %v1238_v26 = vld [vmem:[#allocation2 + $0x1d0] ss:$8 sps:$4 sm:$0xff]   ;;  %v1291_v34 = vld [vmem:[#allocation4 + $0xf4] ss:$8 sps:$4 sm:$0xff]  }
  0x41   :  { %773 = vmatprep.subr.bf16.mxu1 %v1261_v43  ;;  %v1245_v30 = vld [vmem:[%s1501_s0 + $0x8] ss:$16 sps:$4 sm:$0xff]   ;;  %vm988_vm2 = vcmask 64512  }
  0x42   :  { %v1287_v31 = vld [vmem:[#allocation4 + $0xd0] ss:$8 sps:$4 sm:$0xff]  }
  0x43   :  { %482 = vmatpush1.bf16.msra.mxu0 %v1171_v16  ;;  %v1228_v16 = vld [vmem:[#allocation2 + $0x194] ss:$8 sps:$4 sm:$0xff]   ;;  %v1293_v35 = vld [vmem:[#allocation4 + $0xf0] ss:$8 sps:$4 sm:$0xff]  }
  0x44   :  { %483 = vmatprep.subr.bf16.mxu0 %v1172_v17  ;;  %774 = vmatpush1.bf16.msra.mxu1 %v1263_v48  ;;  %v1226_v17 = vld [vmem:[#allocation2 + $0x190] ss:$8 sps:$4 sm:$0xff]  }
  0x45   :  { %775 = vmatprep.subr.bf16.mxu1 %v1264_v50 }
  0x47   :  { %484 = vmatpush1.bf16.msra.mxu0 %v1174_v18  ;;  %v1231_v18 = vld [vmem:[#allocation2 + $0x1a4] ss:$8 sps:$4 sm:$0xff]  }
  0x48   :  { %485 = vmatprep.subr.bf16.mxu0 %v1175_v19  ;;  %776 = vmatpush1.bf16.msra.mxu1 %v1266_v51  ;;  %v1229_v19 = vld [vmem:[#allocation2 + $0x1a0] ss:$8 sps:$4 sm:$0xff]  }
  0x49   :  { %777 = vmatprep.subr.bf16.mxu1 %v1267_v53 }
  0x4b   :  { %486 = vmatpush1.bf16.msra.mxu0 %v1177_v20  ;;  %v1234_v20 = vld [vmem:[#allocation2 + $0x1b4] ss:$8 sps:$4 sm:$0xff]  }
  0x4c   :  { %487 = vmatprep.subr.bf16.mxu0 %v1178_v21  ;;  %778 = vmatpush1.bf16.msra.mxu1 %v1269_v55  ;;  %v1232_v21 = vld [vmem:[#allocation2 + $0x1b0] ss:$8 sps:$4 sm:$0xff]  }
  0x4d   :  { %779 = vmatprep.subr.bf16.mxu1 %v1270_v57 }
  0x4f   :  { %488 = vmatpush1.bf16.msra.mxu0 %v1180_v22  ;;  %v1237_v22 = vld [vmem:[#allocation2 + $0x1c4] ss:$8 sps:$4 sm:$0xff]  }
  0x50   :  { %489 = vmatprep.subr.bf16.mxu0 %v1181_v23  ;;  %780 = vmatpush1.bf16.msra.mxu1 %v1272_v59  ;;  %v1235_v23 = vld [vmem:[#allocation2 + $0x1c0] ss:$8 sps:$4 sm:$0xff]  }
  0x51   :  { %781 = vmatprep.subr.bf16.mxu1 %v1273_v61  ;;  %v1296_v59 = vld [vmem:[%s1506_s5 + $0x48] sm:$0xff]   ;;  %v1298_v61 = vld [vmem:[%s1506_s5 + $0x50] sm:$0xff]  }
  0x53   :  { %490 = vmatpush1.bf16.msra.mxu0 %v1183_v24  ;;  %v1240_v24 = vld [vmem:[#allocation2 + $0x1d4] ss:$8 sps:$4 sm:$0xff]  }
  0x54   :  { %491 = vmatprep.subr.bf16.mxu0 %v1184_v25  ;;  %782 = vmatpush1.bf16.msra.mxu1 %v1275_v63  ;;  %v119_v25 = vld [vmem:[#allocation2 + $0x1e0] sm:$0x77]  ;;  %v1300_v63 = vld [vmem:[%s1506_s5 + $0x58] sm:$0xff]  }
  0x55   :  { %783 = vmatprep.subr.bf16.mxu1 %v1276_v1  ;;  %v1062_v27 = vcombine.high %v119_v25, %v119_v25  ;;  %v1061_v28 = vcombine.low %v119_v25, %v119_v25  ;;  %v1302_v1 = vld [vmem:[%s1506_s5 + $0x60] sm:$0xff]  }
  0x57   :  { %492 = vmatpush1.bf16.msra.mxu0 %v1186_v29  ;;  %v462_v29 = vsel %vm460_vm1, %v1061_v28, 0 }
  0x58   :  { %493 = vmatprep.subr.bf16.mxu0 %v1187_v32  ;;  %784 = vmatpush1.bf16.msra.mxu1 %v1278_v3  ;;  %v1288_v32 = vld [vmem:[#allocation4 + $0xe4] ss:$8 sps:$4 sm:$0xff]  }
  0x59   :  { %785 = vmatprep.subr.bf16.mxu1 %v1279_v5  ;;  %v1304_v3 = vld [vmem:[%s1506_s5 + $0x68] sm:$0xff]   ;;  %v1306_v5 = vld [vmem:[%s1506_s5 + $0x70] sm:$0xff]  }
  0x5b   :  { %494 = vmatpush1.bf16.msra.mxu0 %v1189_v33  ;;  %v1290_v33 = vld [vmem:[#allocation4 + $0xe0] ss:$8 sps:$4 sm:$0xff]  }
  0x5c   :  { %495 = vmatprep.subr.bf16.mxu0 %v1190_v36  ;;  %786 = vmatpush1.bf16.msra.mxu1 %v1281_v7  ;;  %v1294_v36 = vld [vmem:[%s1506_s5 + $0x40] sm:$0xff]   ;;  %v1308_v7 = vld [vmem:[%s1506_s5 + $0x78] sm:$0xff]  }
  0x5d   :  { %787 = vmatprep.subr.bf16.mxu1 %v1282_v9  ;;  %v591_v9 = vld [vmem:[%s1505_s4] sm:$0x3] }
  0x5f   :  { %496 = vmatpush1.bf16.msra.mxu0 %v1192_v37  ;;  %v122_v37 = vlaneseq }
  0x60   :  { %497 = vmatprep.subr.bf16.mxu0 %v1193_v40  ;;  %788 = vmatpush1.bf16.msra.mxu1 %v1284_v11  ;;  %v120_v40 = vld [vmem:[%s1503_s2] sm:$0x3] }
  0x61   :  { %789 = vmatprep.subr.bf16.mxu1 %v1285_v13  ;;  %v123_v38 = vshrl.u32 %v122_v37, 7 }
  0x63   :  { %498 = vmatpush1.bf16.msra.mxu0 %v1195_v41  ;;  %v124_v39 = vsub.s32 0, %v123_v38  ;;  %v128_v41 = vsub.s32 1, %v123_v38 }
  0x64   :  { %510 = vmatprep.subr.bf16.mxu0 %v1201_v45  ;;  %790 = vmatpush1.bf16.msra.mxu1 %v1287_v31 }
  0x65   :  { %791 = vmatprep.subr.bf16.mxu1 %v1288_v32  ;;  %v125_v42 = vrot.slane %v120_v40, %v124_v39  ;;  %v129_v43 = vrot.slane %v120_v40, %v128_v41  ;;  %v600_v11 = vrot.slane %v591_v9, %v128_v41 }
  0x66   :  { %500 = vmatmul.mubr.bf16.vlgmr.msra.gmra.mrb[0].mxu0 %v1196_v44 }
  0x67   :  { %511 = vmatpush1.bf16.msra.mxu0 %v1199_v46  ;;  %1064 = vmatprep.mubr.msk.bf16.mxu0 %vm456_vm0, %v1243_v47 }
  0x68   :  { %512 = vmatprep.subr.bf16.mxu0 %v1204_v49  ;;  %792 = vmatpush1.bf16.msra.mxu1 %v1290_v33 }
  0x69   :  { %793 = vmatprep.subr.bf16.mxu1 %v1291_v34 }
  0x6b   :  { %513 = vmatpush1.bf16.msra.mxu0 %v1202_v52 }
  0x6c   :  { %514 = vmatprep.subr.bf16.mxu0 %v1207_v54  ;;  %794 = vmatpush1.bf16.msra.mxu1 %v1293_v35 }
  0x6d   :  { %1114 = vmatprep.subr.bf16.mxu1 %v1294_v36 }
  0x6f   :  { %515 = vmatpush1.bf16.msra.mxu0 %v1205_v56 }
  0x70   :  { %516 = vmatprep.subr.bf16.mxu0 %v1210_v58  ;;  %v1295_v58 = vld [vmem:[%s1506_s5] sm:$0xff]  }
  0x73   :  { %517 = vmatpush1.bf16.msra.mxu0 %v1208_v60  ;;  %v1297_v60 = vld [vmem:[%s1506_s5 + $0x8] sm:$0xff]  }
  0x74   :  { %518 = vmatprep.subr.bf16.mxu0 %v1213_v62  ;;  %v1299_v62 = vld [vmem:[%s1506_s5 + $0x10] sm:$0xff]  }
  0x77   :  { %519 = vmatpush1.bf16.msra.mxu0 %v1211_v0  ;;  %v1301_v0 = vld [vmem:[%s1506_s5 + $0x18] sm:$0xff]  }
  0x78   :  { %520 = vmatprep.subr.bf16.mxu0 %v1216_v2  ;;  %v1303_v2 = vld [vmem:[%s1506_s5 + $0x20] sm:$0xff]  }
  0x7b   :  { %521 = vmatpush1.bf16.msra.mxu0 %v1214_v4  ;;  %v1305_v4 = vld [vmem:[%s1506_s5 + $0x28] sm:$0xff]  }
  0x7c   :  { %522 = vmatprep.subr.bf16.mxu0 %v1219_v6  ;;  %v1307_v6 = vld [vmem:[%s1506_s5 + $0x30] sm:$0xff]  }
  0x7f   :  { %523 = vmatpush1.bf16.msra.mxu0 %v1217_v8  ;;  %v1309_v8 = vld [vmem:[%s1506_s5 + $0x38] sm:$0xff]  }
  0x80   :  { %524 = vmatprep.subr.bf16.mxu0 %v1222_v10  ;;  %v596_v10 = vrot.slane %v591_v9, %v124_v39 }
  0x83   :  { %525 = vmatpush1.bf16.msra.mxu0 %v1220_v12 }
  0x84   :  { %526 = vmatprep.subr.bf16.mxu0 %v1225_v14 }
  0x87   :  { %527 = vmatpush1.bf16.msra.mxu0 %v1223_v15 }
  0x88   :  { %528 = vmatprep.subr.bf16.mxu0 %v1228_v16 }
  0x8b   :  { %529 = vmatpush1.bf16.msra.mxu0 %v1226_v17 }
  0x8c   :  { %530 = vmatprep.subr.bf16.mxu0 %v1231_v18 }
  0x8f   :  { %531 = vmatpush1.bf16.msra.mxu0 %v1229_v19 }
  0x90   :  { %532 = vmatprep.subr.bf16.mxu0 %v1234_v20 }
  0x93   :  { %533 = vmatpush1.bf16.msra.mxu0 %v1232_v21 }
  0x94   :  { %534 = vmatprep.subr.bf16.mxu0 %v1237_v22 }
  0x97   :  { %535 = vmatpush1.bf16.msra.mxu0 %v1235_v23 }
  0x98   :  { %536 = vmatprep.subr.bf16.mxu0 %v1240_v24 }
  0x9b   :  { %537 = vmatpush1.bf16.msra.mxu0 %v1238_v26 }
  0x9c   :  { %1063 = vmatprep.subr.msk.bf16.mxu0 %vm460_vm1, %v1062_v27  ;;  %v1097_v27 = vld [vmem:[%s1507_s6] ss:$0 sm:$0xff] }
  0x9f   :  { %539 = vmatpush1.bf16.msra.mxu0 %v462_v29 }
  0xa2   :  { %543 = vmatmul.mubr.bf16.vlgmr.msra.gmra.mrb[0].mxu0 %v1245_v30 }
 0x175   :  { %v544_v44 = vpop.f32.mrb[0].mxu0 }
 0x176   :  { %v1136_v45 = vadd.f32 %v544_v44, %v125_v42  ;;  %v546_v46 = vpop.f32.mrb[1].mxu0 }
 0x177   :  { %v1137_v47 = vadd.f32 %v546_v46, %v129_v43  ;;  %v548_v48 = vpop.f32.mrb[2].mxu0 }
 0x178   :  { %v1138_v49 = vadd.f32 %v548_v48, %v125_v42  ;;  %v550_v50 = vpop.f32.mrb[3].mxu0  ;;  %v553_v52 = vmax.f32 %v1136_v45, 0.0 }
 0x179   :  { %v1139_v51 = vadd.f32 %v550_v50, %v129_v43  ;;  %v554_v54 = vmax.f32 %v1137_v47, 0.0 }
 0x17a   :  { %v555_v53 = vmax.f32 %v1138_v49, 0.0 }
 0x17b   :  { %v556_v55 = vmax.f32 %v1139_v51, 0.0 }
 0x17c   :  { %v557_v56 = vpack.c.bf16 %v555_v53, %v553_v52 }
 0x17d   :  { %v558_v57 = vpack.c.bf16 %v556_v55, %v554_v54 }
 0x17f   :  { %795 = vmatprep.mubr.bf16.mxu1 %v558_v57 }
 0x180   :  { %796 = vmatmul.mubr.bf16.vlgmr.msra.gmra.mrb[0].mxu1 %v557_v56 }
 0x181   :  { %1115 = vmatpush3.bf16.msra.mxu1 %v1295_v58 }
 0x182   :  { %1116 = vmatprep.subr.bf16.mxu1 %v1296_v59 }
 0x185   :  { %1117 = vmatpush3.bf16.msra.mxu1 %v1297_v60 }
 0x186   :  { %1118 = vmatprep.subr.bf16.mxu1 %v1298_v61 }
 0x189   :  { %1119 = vmatpush3.bf16.msra.mxu1 %v1299_v62 }
 0x18a   :  { %1120 = vmatprep.subr.bf16.mxu1 %v1300_v63 }
 0x18d   :  { %1121 = vmatpush3.bf16.msra.mxu1 %v1301_v0 }
 0x18e   :  { %1122 = vmatprep.subr.bf16.mxu1 %v1302_v1 }
 0x191   :  { %1123 = vmatpush3.bf16.msra.mxu1 %v1303_v2 }
 0x192   :  { %1124 = vmatprep.subr.bf16.mxu1 %v1304_v3 }
 0x195   :  { %1125 = vmatpush3.bf16.msra.mxu1 %v1305_v4 }
 0x196   :  { %1126 = vmatprep.subr.bf16.mxu1 %v1306_v5 }
 0x199   :  { %1127 = vmatpush3.bf16.msra.mxu1 %v1307_v6 }
 0x19a   :  { %1128 = vmatprep.subr.bf16.mxu1 %v1308_v7 }
 0x19d   :  { %1129 = vmatpush3.bf16.msra.mxu1 %v1309_v8 }
 0x253   :  { %v797_v12 = vpop.f32.mrb[0].mxu1 }
 0x254   :  { %v798_v13 = vadd.f32 %v797_v12, %v596_v10  ;;  %v799_v14 = vpop.f32.mrb[1].mxu1 }
 0x255   :  { %v800_v15 = vadd.f32 %v799_v14, %v600_v11  ;;  %v801_v16 = vpop.f32.mrb[2].mxu1 }
 0x256   :  { %v802_v17 = vadd.f32 %v801_v16, %v596_v10  ;;  %v803_v18 = vpop.f32.mrb[3].mxu1  ;;  %v806_v20 = vmax.f32 %v798_v13, 0.0 }
 0x257   :  { %v804_v19 = vadd.f32 %v803_v18, %v600_v11  ;;  %v807_v22 = vmax.f32 %v800_v15, 0.0 }
 0x258   :  { %v808_v21 = vmax.f32 %v802_v17, 0.0 }
 0x259   :  { %v809_v23 = vmax.f32 %v804_v19, 0.0 }
 0x25a   :  { %v810_v24 = vpack.c.bf16 %v808_v21, %v806_v20 }
 0x25b   :  { %v811_v25 = vpack.c.bf16 %v809_v23, %v807_v22 }
 0x25d   :  { %979 = vmatprep.mubr.bf16.mxu1 %v811_v25 }
 0x25e   :  { %980 = vmatmul.mubr.bf16.vlgmr.msra.gmra.mrb[4].mxu1 %v810_v24 }
 0x331   :  { %v1130_v26 = vpop.f32.mrb[4].mxu1 }
 0x332   :  { %v1131_v28 = vpop.f32.mrb[5].mxu1 }
 0x333   :  { %v1132_v29 = vadd.f32 %v1131_v28, %v1130_v26  ;;  %v1133_v30 = vpop.f32.mrb[6].mxu1 }
 0x334   :  { %v1134_v31 = vpop.f32.mrb[7].mxu1 }
 0x335   :  { %v982_v32 = vadd.f32 %v1132_v29, %v1097_v27  ;;  %v1135_v33 = vadd.f32 %v1134_v31, %v1133_v30 }
 0x337   :  { %989 = vst.msk [vmem:[%s1508_s7] sm:$0xff] %vm988_vm2, %v982_v32  ;;  %v985_v34 = vadd.f32 %v1135_v33, %v1097_v27 }
 0x339   :  { %990 = vst.msk [vmem:[%s1508_s7 + $0x8] sm:$0xff] %vm988_vm2, %v985_v34 }
 0x33a   :  { %995 = vsyncpa [#allocation3], 1 }
 0x33b   :  { %996 = vsyncpa [#allocation5], 1 }

</bundles_post_ra>
